<compile_context>
chip_gen: v7x
topology: tpu7x:2x2x1
jax: 0.10.0
libtpu: 0.0.40
codegen_flags: <defaults>
</compile_context>

<pallas_src>
import math
from functools import partial

import jax
import jax.numpy as jnp
from jax.experimental import pallas as pl
from jax.experimental.pallas import tpu as pltpu

_EPS_SEL = 1e-9   # select_candidates_in_gts eps
_EPS_IOU = 1e-7   # bbox_iou eps


def _fast_pow(x, p):
    """x ** p with integer p specialized to VPU multiplies (binary exponentiation)."""
    p = float(p)
    if p == int(p) and 0.0 <= p <= 64.0:
        n = int(p)
        if n == 0:
            return jnp.ones_like(x)
        result = None
        base = x
        while n > 0:
            if n & 1:
                result = base if result is None else result * base
            n >>= 1
            if n:
                base = base * base
        return result
    return jnp.power(x, p)


def _pick_a_tile(a):
    """Largest anchor tile (multiple of 128) dividing A with >= 2 tiles; else full A."""
    for t in (2048, 1024, 512, 256, 128):
        if a % t == 0 and a // t >= 2:
            return t
    for t in (2048, 1024, 512, 256, 128):
        if a % t == 0:
            return t
    return a


# ------------------------------------------------------------------
# Input packing (wrapper-side, all O(B*(A+M)))
#   pd_slab (B, 8, A): rows [x1, y1, x2, y2, atan(w2/h2), anc_x, anc_y, 0]
#   gt_slab (B, M_pad, 8): cols [x1, y1, x2, y2, label, mask_gt, atan(w1/h1), 0]
# ------------------------------------------------------------------
def _pack_slabs(pd_bboxes, anc_points, gt_labels, gt_bboxes, mask_gt, m_pad):
    B, A, _ = pd_bboxes.shape
    M = gt_bboxes.shape[1]

    pdb = pd_bboxes.astype(jnp.float32)
    w2 = pdb[..., 2] - pdb[..., 0]
    h2 = pdb[..., 3] - pdb[..., 1] + _EPS_IOU
    atan_pd = jnp.arctan(w2 / h2)                                        # (B, A)
    anc = jnp.broadcast_to(anc_points.astype(jnp.float32).T[None], (B, 2, A))
    pd_slab = jnp.concatenate(
        [jnp.transpose(pdb, (0, 2, 1)),                                  # (B, 4, A)
         atan_pd[:, None, :],                                            # (B, 1, A)
         anc,                                                            # (B, 2, A)
         jnp.zeros((B, 1, A), jnp.float32)], axis=1)                     # (B, 8, A)

    gtb = gt_bboxes.astype(jnp.float32)
    w1 = gtb[..., 2] - gtb[..., 0]
    h1 = gtb[..., 3] - gtb[..., 1] + _EPS_IOU
    atan_gt = jnp.arctan(w1 / h1)                                        # (B, M)
    gt_slab = jnp.concatenate(
        [gtb,                                                            # (B, M, 4)
         gt_labels.reshape(B, M, 1).astype(jnp.float32),
         mask_gt.reshape(B, M, 1).astype(jnp.float32),
         atan_gt[..., None],
         jnp.zeros((B, M, 1), jnp.float32)], axis=-1)                    # (B, M, 8)
    if m_pad > M:
        gt_slab = jnp.pad(gt_slab, ((0, 0), (0, m_pad - M), (0, 0)))     # padded rows: mask_gt=0
    return pd_slab, gt_slab


# ------------------------------------------------------------------
# Kernel 1: per (batch, anchor-tile) metrics
#   - in-gt candidate mask (internal only)
#   - class-score gather via one-hot matmul (MXU)
#   - CIoU (xywh=False), align_metric = scores**alpha * overlaps**beta
# ------------------------------------------------------------------
def _metrics_kernel(pd_scores_ref, pd_slab_ref, gt_slab_ref,
                    overlaps_ref, align_ref, *, alpha, beta):
    scores = pd_scores_ref[0]      # (A_t, C)
    pd = pd_slab_ref[0]            # (8, A_t)
    gt = gt_slab_ref[0]            # (M, 8)

    M = gt.shape[0]
    C = scores.shape[1]

    b2x1 = pd[0:1, :]; b2y1 = pd[1:2, :]; b2x2 = pd[2:3, :]; b2y2 = pd[3:4, :]
    atan_pd = pd[4:5, :]
    cx = pd[5:6, :]; cy = pd[6:7, :]

    b1x1 = gt[:, 0:1]; b1y1 = gt[:, 1:2]; b1x2 = gt[:, 2:3]; b1y2 = gt[:, 3:4]
    labels = gt[:, 4:5].astype(jnp.int32)
    mgt = gt[:, 5:6]
    atan_gt = gt[:, 6:7]

    # ---- select_candidates_in_gts (combined with mask_gt) ----
    d = jnp.minimum(jnp.minimum(cx - b1x1, cy - b1y1),
                    jnp.minimum(b1x2 - cx, b1y2 - cy))                   # (M, A_t)
    mask = jnp.logical_and(d > _EPS_SEL, mgt > 0.0)

    # ---- bbox_scores: gather pd_scores[:, gt_label] via one-hot matmul ----
    cls_iota = jax.lax.broadcasted_iota(jnp.int32, (M, C), 1)
    onehot = (cls_iota == labels).astype(jnp.float32)                    # (M, C)
    gathered = jax.lax.dot_general(onehot, scores, (((1,), (1,)), ((), ())),
                                   preferred_element_type=jnp.float32)   # (M, A_t)
    bbox_scores = jnp.where(mask, gathered, 0.0)

    # ---- CIoU (xywh=False) ----
    w1 = b1x2 - b1x1
    h1 = b1y2 - b1y1 + _EPS_IOU
    w2 = b2x2 - b2x1
    h2 = b2y2 - b2y1 + _EPS_IOU
    inter = (jnp.maximum(jnp.minimum(b1x2, b2x2) - jnp.maximum(b1x1, b2x1), 0.0) *
             jnp.maximum(jnp.minimum(b1y2, b2y2) - jnp.maximum(b1y1, b2y1), 0.0))
    union = w1 * h1 + w2 * h2 - inter + _EPS_IOU
    iou = inter * pl.reciprocal(union, approx=True)
    cw = jnp.maximum(b1x2, b2x2) - jnp.minimum(b1x1, b2x1)
    ch = jnp.maximum(b1y2, b2y2) - jnp.minimum(b1y1, b2y1)
    c2 = cw * cw + ch * ch + _EPS_IOU
    rho2 = ((b2x1 + b2x2 - b1x1 - b1x2) ** 2 +
            (b2y1 + b2y2 - b1y1 - b1y2) ** 2) * 0.25
    v = (4.0 / math.pi ** 2) * (atan_pd - atan_gt) ** 2                  # (M, A_t)
    alpha_c = v * pl.reciprocal(v - iou + (1.0 + _EPS_IOU), approx=True)
    ciou = iou - (rho2 * pl.reciprocal(c2, approx=True) + v * alpha_c)
    overlaps = jnp.where(mask, jnp.maximum(ciou, 0.0), 0.0)

    align = _fast_pow(bbox_scores, alpha) * _fast_pow(overlaps, beta)

    overlaps_ref[0] = overlaps
    align_ref[0] = align


def _compute_metrics(pd_scores, pd_slab, gt_slab, alpha, beta, a_tile):
    B, A, C = pd_scores.shape
    M = gt_slab.shape[1]
    kernel = partial(_metrics_kernel, alpha=alpha, beta=beta)
    overlaps, align = pl.pallas_call(
        kernel,
        out_shape=(jax.ShapeDtypeStruct((B, M, A), jnp.float32),
                   jax.ShapeDtypeStruct((B, M, A), jnp.float32)),
        grid=(B, A // a_tile),
        in_specs=[
            pl.BlockSpec((1, a_tile, C), lambda b, a: (b, a, 0)),   # pd_scores
            pl.BlockSpec((1, 8, a_tile), lambda b, a: (b, 0, a)),   # pd slab
            pl.BlockSpec((1, M, 8), lambda b, a: (b, 0, 0)),        # gt slab
        ],
        out_specs=[
            pl.BlockSpec((1, M, a_tile), lambda b, a: (b, 0, a)),
            pl.BlockSpec((1, M, a_tile), lambda b, a: (b, 0, a)),
        ],
        compiler_params=pltpu.CompilerParams(
            dimension_semantics=("parallel", "arbitrary")),
    )(pd_scores.astype(jnp.float32), pd_slab, gt_slab)
    return overlaps, align


# ------------------------------------------------------------------
# Kernel 3: fused top-k counting + in-gts mask  ->  mask_pos
# Replaces the plain-JAX (B, M, topk, A) one-hot-count intermediate.
# ------------------------------------------------------------------
def _mask_pos_kernel(idxs_ref, gt_slab_ref, pd_slab_ref, out_ref, *, topk, a_tile):
    a0 = pl.program_id(1) * a_tile
    idxs = idxs_ref[0]               # (M, topk) int32 (already masked-to-0)
    gt = gt_slab_ref[0]              # (M, 8)
    pd = pd_slab_ref[0]              # (8, A_t)
    M = idxs.shape[0]

    cx = pd[5:6, :]; cy = pd[6:7, :]
    b1x1 = gt[:, 0:1]; b1y1 = gt[:, 1:2]; b1x2 = gt[:, 2:3]; b1y2 = gt[:, 3:4]
    mgt = gt[:, 5:6]

    d = jnp.minimum(jnp.minimum(cx - b1x1, cy - b1y1),
                    jnp.minimum(b1x2 - cx, b1y2 - cy))
    mask_c = jnp.logical_and(d > _EPS_SEL, mgt > 0.0)                    # (M, A_t)

    anchor_id = jax.lax.broadcasted_iota(jnp.int32, (M, a_tile), 1) + a0
    count = jnp.zeros((M, a_tile), jnp.int32)
    for k in range(topk):                                                # static unroll
        count = count + (idxs[:, k:k + 1] == anchor_id).astype(jnp.int32)
    mask_topk = jnp.where(count > 1, 0, count).astype(jnp.float32)
    out_ref[0] = jnp.where(mask_c, mask_topk, 0.0)


def _select_mask_pos(topk_idxs, gt_slab, pd_slab, topk, a_tile):
    B, M, _ = topk_idxs.shape
    A = pd_slab.shape[2]
    kernel = partial(_mask_pos_kernel, topk=topk, a_tile=a_tile)
    return pl.pallas_call(
        kernel,
        out_shape=jax.ShapeDtypeStruct((B, M, A), jnp.float32),
        grid=(B, A // a_tile),
        in_specs=[
            pl.BlockSpec((1, M, topk), lambda b, a: (b, 0, 0)),
            pl.BlockSpec((1, M, 8), lambda b, a: (b, 0, 0)),
            pl.BlockSpec((1, 8, a_tile), lambda b, a: (b, 0, a)),
        ],
        out_specs=pl.BlockSpec((1, M, a_tile), lambda b, a: (b, 0, a)),
        compiler_params=pltpu.CompilerParams(
            dimension_semantics=("parallel", "arbitrary")),
    )(topk_idxs.astype(jnp.int32), gt_slab, pd_slab)


# ------------------------------------------------------------------
# Kernel 2: one-hot target scores, masked by fg_mask and scaled by the
# normalized align metric.  Output is lane-dense (classes padded to 128).
# ------------------------------------------------------------------
def _target_scores_kernel(slab_ref, out_ref):
    slab = slab_ref[0]               # (A_t, 3): [label, fg, norm]
    labels = slab[:, 0:1].astype(jnp.int32)
    fg = slab[:, 1:2]
    norm = slab[:, 2:3]
    A_t = slab.shape[0]
    C_pad = out_ref.shape[2]
    cls_iota = jax.lax.broadcasted_iota(jnp.int32, (A_t, C_pad), 1)
    onehot = (cls_iota == labels).astype(jnp.float32)
    out_ref[0] = onehot * jnp.where(fg > 0.0, norm, 0.0)


def _target_scores(target_labels, fg_mask, norm_align, num_classes, a_tile):
    B, A = target_labels.shape
    c_pad = ((num_classes + 127) // 128) * 128
    slab = jnp.stack([target_labels.astype(jnp.float32),
                      fg_mask.astype(jnp.float32),
                      norm_align.astype(jnp.float32)], axis=-1)          # (B, A, 3)
    out = pl.pallas_call(
        _target_scores_kernel,
        out_shape=jax.ShapeDtypeStruct((B, A, c_pad), jnp.float32),
        grid=(B, A // a_tile),
        in_specs=[pl.BlockSpec((1, a_tile, 3), lambda b, a: (b, a, 0))],
        out_specs=pl.BlockSpec((1, a_tile, c_pad), lambda b, a: (b, a, 0)),
        compiler_params=pltpu.CompilerParams(
            dimension_semantics=("parallel", "arbitrary")),
    )(slab)
    if c_pad != num_classes:
        out = out[..., :num_classes]
    return out


# ------------------------------------------------------------------
# TaskAlignedAssigner forward (no learnable parameters)
# ------------------------------------------------------------------
class TaskAlignedAssigner:
    def __init__(self, topk=13, num_classes=80, alpha=1.0, beta=6.0, eps=1e-9):
        self.topk = topk
        self.num_classes = num_classes
        self.bg_idx = num_classes
        self.alpha = alpha
        self.beta = beta
        self.eps = eps

    def __call__(self, pd_scores, pd_bboxes, anc_points, gt_labels, gt_bboxes, mask_gt):
        bs, na, nc = pd_scores.shape
        n_max_boxes = gt_bboxes.shape[1]
        if n_max_boxes == 0:
            return (jnp.full((bs, na), self.bg_idx, jnp.int32),
                    jnp.zeros_like(pd_bboxes),
                    jnp.zeros_like(pd_scores),
                    jnp.zeros((bs, na), jnp.bool_),
                    jnp.zeros((bs, na), jnp.int32))

        a_tile = _pick_a_tile(na)
        m_pad = max(8, ((n_max_boxes + 7) // 8) * 8)     # fill f32 sublanes

        pd_slab, gt_slab = _pack_slabs(pd_bboxes, anc_points, gt_labels,
                                       gt_bboxes, mask_gt, m_pad)
        gt_bboxes_pad = gt_slab[..., :4]                              # (B, M_pad, 4)
        gt_labels_pad = gt_slab[..., 4].astype(jnp.int32)             # (B, M_pad)
        mask_gt_pad = gt_slab[..., 5]                                 # (B, M_pad)

        # ---- hot path (Pallas kernel 1): overlaps + align_metric ----
        overlaps, align_metric = _compute_metrics(
            pd_scores, pd_slab, gt_slab, self.alpha, self.beta, a_tile)

        # ---- select_topk_candidates ----
        # TODO(synk): torch.topk tie-breaking order is not bit-reproduced by lax.top_k.
        _, topk_idxs = jax.lax.top_k(align_metric, self.topk)         # (B, M_pad, topk)
        topk_idxs = jnp.where(mask_gt_pad[..., None] > 0, topk_idxs, 0)
        # fused count / >1-drop / in-gts / mask_gt  (Pallas kernel 3)
        mask_pos = _select_mask_pos(topk_idxs, gt_slab, pd_slab, self.topk, a_tile)

        # ---- select_highest_overlaps ----
        fg_mask = mask_pos.sum(-2)
        mask_multi_gts = fg_mask[:, None, :] > 1
        max_overlaps_idx = jnp.argmax(overlaps, axis=1)
        is_max = jnp.transpose(
            jax.nn.one_hot(max_overlaps_idx, m_pad, dtype=mask_pos.dtype), (0, 2, 1))
        mask_pos = jnp.where(mask_multi_gts, is_max, mask_pos)
        fg_mask = mask_pos.sum(-2)
        target_gt_idx = jnp.argmax(mask_pos, axis=-2)

        # ---- get_targets (gathers) ----
        batch_ind = jnp.arange(bs)[:, None]
        flat_idx = target_gt_idx + batch_ind * m_pad
        target_labels = gt_labels_pad.reshape(-1)[flat_idx]
        target_bboxes = gt_bboxes_pad.reshape(-1, 4)[flat_idx]
        target_labels = jnp.maximum(target_labels, 0)

        # ---- normalization of the align metric ----
        align_metric = align_metric * mask_pos
        pos_align_metrics = align_metric.max(-1, keepdims=True)
        pos_overlaps = (overlaps * mask_pos).max(-1, keepdims=True)
        norm_align_metric = (align_metric * pos_overlaps /
                             (pos_align_metrics + self.eps)).max(-2)   # (B, A)

        # ---- target scores (Pallas kernel 2, lane-dense output) ----
        target_scores = _target_scores(target_labels, fg_mask, norm_align_metric,
                                       self.num_classes, a_tile)

        return (target_labels, target_bboxes, target_scores,
                fg_mask > 0, target_gt_idx)


if __name__ == "__main__":
    key = jax.random.PRNGKey(0)
    B, H, W, C, M = 2, 16, 16, 80, 4
    A = H * W
    k1, k2, k3, k4, k5, k6 = jax.random.split(key, 6)

    pd_scores = jax.nn.sigmoid(jax.random.normal(k1, (B, A, C), jnp.float32))

    xs = jnp.arange(W, dtype=jnp.float32) + 0.5
    ys = jnp.arange(H, dtype=jnp.float32) + 0.5
    gx, gy = jnp.meshgrid(xs, ys)
    anc_points = jnp.stack([gx.reshape(-1), gy.reshape(-1)], axis=-1)   # (A, 2)

    lt = jax.random.uniform(k2, (B, A, 2), minval=0.5, maxval=3.0)
    rb = jax.random.uniform(k3, (B, A, 2), minval=0.5, maxval=3.0)
    pd_bboxes = jnp.concatenate([anc_points[None] - lt,
                                 anc_points[None] + rb], axis=-1)        # (B, A, 4) xyxy

    gt_labels = jax.random.randint(k4, (B, M, 1), 0, C).astype(jnp.int32)
    cxy = jax.random.uniform(k5, (B, M, 2), minval=4.0, maxval=12.0)
    wh = jax.random.uniform(k6, (B, M, 2), minval=4.0, maxval=8.0)
    gt_bboxes = jnp.concatenate([cxy - wh / 2, cxy + wh / 2], axis=-1)   # (B, M, 4) xyxy
    mask_gt = jnp.array([[1., 1., 1., 0.],
                         [1., 1., 0., 0.]], jnp.float32)[..., None]      # (B, M, 1)

    assigner = TaskAlignedAssigner(topk=13, num_classes=C, alpha=1.0, beta=6.0)
    outs = assigner(pd_scores, pd_bboxes, anc_points, gt_labels, gt_bboxes, mask_gt)
    jax.block_until_ready(outs)

    tl, tb, ts, fg, tgi = outs
    assert tl.shape == (B, A) and tb.shape == (B, A, 4)
    assert ts.shape == (B, A, C) and fg.shape == (B, A) and tgi.shape == (B, A)
    assert bool(jnp.all(jnp.isfinite(ts)))
    print("KERNEL_OK")
</pallas_src>

<mosaic_0001>
module attributes {stable_mosaic.version = 11 : i64} {
  func.func @_metrics_kernel(%arg0: i32, %arg1: i32, %arg2: memref<1x128x80xf32, #tpu.memory_space<vmem>>, %arg3: memref<1x8x128xf32, #tpu.memory_space<vmem>>, %arg4: memref<1x8x8xf32, #tpu.memory_space<vmem>>, %arg5: memref<1x8x128xf32, #tpu.memory_space<vmem>>, %arg6: memref<1x8x128xf32, #tpu.memory_space<vmem>>) attributes {dimension_semantics = [#tpu.dimension_semantics<parallel>, #tpu.dimension_semantics<arbitrary>], iteration_bounds = array<i64: 2, 2>, scalar_prefetch = 0 : i64, scratch_operands = 0 : i64, tpu.core_type = #tpu.core_type<tc>, window_params = [{transform_indices = @transform_0, window_bounds = array<i64: 1, 128, 80>}, {transform_indices = @transform_1, window_bounds = array<i64: 1, 8, 128>}, {transform_indices = @transform_2, window_bounds = array<i64: 1, 8, 8>}, {transform_indices = @transform_3, window_bounds = array<i64: 1, 8, 128>}, {transform_indices = @transform_4, window_bounds = array<i64: 1, 8, 128>}]} {
    %c0 = arith.constant 0 : index
    %c0_0 = arith.constant 0 : index
    %c0_1 = arith.constant 0 : index
    %0 = vector.load %arg2[%c0, %c0_0, %c0_1] : memref<1x128x80xf32, #tpu.memory_space<vmem>>, vector<1x128x80xf32>
    %1 = vector.shape_cast %0 : vector<1x128x80xf32> to vector<128x80xf32>
    %c0_2 = arith.constant 0 : index
    %c0_3 = arith.constant 0 : index
    %c0_4 = arith.constant 0 : index
    %2 = vector.load %arg3[%c0_2, %c0_3, %c0_4] : memref<1x8x128xf32, #tpu.memory_space<vmem>>, vector<1x8x128xf32>
    %3 = vector.shape_cast %2 : vector<1x8x128xf32> to vector<8x128xf32>
    %c0_5 = arith.constant 0 : index
    %c0_6 = arith.constant 0 : index
    %c0_7 = arith.constant 0 : index
    %4 = vector.load %arg4[%c0_5, %c0_6, %c0_7] : memref<1x8x8xf32, #tpu.memory_space<vmem>>, vector<1x8x8xf32>
    %5 = vector.shape_cast %4 : vector<1x8x8xf32> to vector<8x8xf32>
    %6 = vector.extract_strided_slice %3 {offsets = [0, 0], sizes = [1, 128], strides = [1, 1]} : vector<8x128xf32> to vector<1x128xf32>
    %7 = vector.extract_strided_slice %3 {offsets = [1, 0], sizes = [1, 128], strides = [1, 1]} : vector<8x128xf32> to vector<1x128xf32>
    %8 = vector.extract_strided_slice %3 {offsets = [2, 0], sizes = [1, 128], strides = [1, 1]} : vector<8x128xf32> to vector<1x128xf32>
    %9 = vector.extract_strided_slice %3 {offsets = [3, 0], sizes = [1, 128], strides = [1, 1]} : vector<8x128xf32> to vector<1x128xf32>
    %10 = vector.extract_strided_slice %3 {offsets = [4, 0], sizes = [1, 128], strides = [1, 1]} : vector<8x128xf32> to vector<1x128xf32>
    %11 = vector.extract_strided_slice %3 {offsets = [5, 0], sizes = [1, 128], strides = [1, 1]} : vector<8x128xf32> to vector<1x128xf32>
    %12 = vector.extract_strided_slice %3 {offsets = [6, 0], sizes = [1, 128], strides = [1, 1]} : vector<8x128xf32> to vector<1x128xf32>
    %13 = vector.extract_strided_slice %5 {offsets = [0, 0], sizes = [8, 1], strides = [1, 1]} : vector<8x8xf32> to vector<8x1xf32>
    %14 = vector.extract_strided_slice %5 {offsets = [0, 1], sizes = [8, 1], strides = [1, 1]} : vector<8x8xf32> to vector<8x1xf32>
    %15 = vector.extract_strided_slice %5 {offsets = [0, 2], sizes = [8, 1], strides = [1, 1]} : vector<8x8xf32> to vector<8x1xf32>
    %16 = vector.extract_strided_slice %5 {offsets = [0, 3], sizes = [8, 1], strides = [1, 1]} : vector<8x8xf32> to vector<8x1xf32>
    %17 = vector.extract_strided_slice %5 {offsets = [0, 4], sizes = [8, 1], strides = [1, 1]} : vector<8x8xf32> to vector<8x1xf32>
    %18 = arith.fptosi %17 : vector<8x1xf32> to vector<8x1xi32>
    %19 = vector.extract_strided_slice %5 {offsets = [0, 5], sizes = [8, 1], strides = [1, 1]} : vector<8x8xf32> to vector<8x1xf32>
    %20 = vector.extract_strided_slice %5 {offsets = [0, 6], sizes = [8, 1], strides = [1, 1]} : vector<8x8xf32> to vector<8x1xf32>
    %21 = vector.broadcast %11 : vector<1x128xf32> to vector<8x128xf32>
    %22 = vector.broadcast %13 : vector<8x1xf32> to vector<8x128xf32>
    %23 = arith.subf %21, %22 : vector<8x128xf32>
    %24 = vector.broadcast %12 : vector<1x128xf32> to vector<8x128xf32>
    %25 = vector.broadcast %14 : vector<8x1xf32> to vector<8x128xf32>
    %26 = arith.subf %24, %25 : vector<8x128xf32>
    %27 = arith.minimumf %23, %26 : vector<8x128xf32>
    %28 = vector.broadcast %15 : vector<8x1xf32> to vector<8x128xf32>
    %29 = vector.broadcast %11 : vector<1x128xf32> to vector<8x128xf32>
    %30 = arith.subf %28, %29 : vector<8x128xf32>
    %31 = vector.broadcast %16 : vector<8x1xf32> to vector<8x128xf32>
    %32 = vector.broadcast %12 : vector<1x128xf32> to vector<8x128xf32>
    %33 = arith.subf %31, %32 : vector<8x128xf32>
    %34 = arith.minimumf %30, %33 : vector<8x128xf32>
    %35 = arith.minimumf %27, %34 : vector<8x128xf32>
    %cst = arith.constant 9.99999971E-10 : f32
    %36 = vector.broadcast %cst : f32 to vector<8x128xf32>
    %37 = arith.cmpf ogt, %35, %36 : vector<8x128xf32>
    %cst_8 = arith.constant 0.000000e+00 : f32
    %38 = vector.broadcast %cst_8 : f32 to vector<8x1xf32>
    %39 = arith.cmpf ogt, %19, %38 : vector<8x1xf32>
    %40 = vector.broadcast %39 : vector<8x1xi1> to vector<8x128xi1>
    %41 = arith.andi %37, %40 : vector<8x128xi1>
    %42 = tpu.iota {dimensions = array<i32: 1>} : vector<8x80xi32>
    %43 = vector.broadcast %18 : vector<8x1xi32> to vector<8x80xi32>
    %44 = arith.cmpi eq, %42, %43 : vector<8x80xi32>
    %45 = arith.extui %44 : vector<8x80xi1> to vector<8x80xi32>
    %46 = arith.sitofp %45 : vector<8x80xi32> to vector<8x80xf32>
    %cst_9 = arith.constant dense<0.000000e+00> : vector<8x128xf32>
    %47 = tpu.matmul %46, %1, %cst_9 {dimension_numbers = #tpu.dot_dimension_numbers<[1], [1], [0], [0], [0, 0, 1, 0], [], []>} : vector<8x80xf32>, vector<128x80xf32>, vector<8x128xf32> -> vector<8x128xf32>
    %cst_10 = arith.constant 0.000000e+00 : f32
    %48 = vector.broadcast %cst_10 : f32 to vector<8x128xf32>
    %49 = arith.select %41, %47, %48 : vector<8x128xi1>, vector<8x128xf32>
    %50 = arith.subf %15, %13 : vector<8x1xf32>
    %51 = arith.subf %16, %14 : vector<8x1xf32>
    %cst_11 = arith.constant 1.000000e-07 : f32
    %52 = vector.broadcast %cst_11 : f32 to vector<8x1xf32>
    %53 = arith.addf %51, %52 : vector<8x1xf32>
    %54 = arith.subf %8, %6 : vector<1x128xf32>
    %55 = arith.subf %9, %7 : vector<1x128xf32>
    %cst_12 = arith.constant 1.000000e-07 : f32
    %56 = vector.broadcast %cst_12 : f32 to vector<1x128xf32>
    %57 = arith.addf %55, %56 : vector<1x128xf32>
    %58 = vector.broadcast %15 : vector<8x1xf32> to vector<8x128xf32>
    %59 = vector.broadcast %8 : vector<1x128xf32> to vector<8x128xf32>
    %60 = arith.minimumf %58, %59 : vector<8x128xf32>
    %61 = vector.broadcast %13 : vector<8x1xf32> to vector<8x128xf32>
    %62 = vector.broadcast %6 : vector<1x128xf32> to vector<8x128xf32>
    %63 = arith.maximumf %61, %62 : vector<8x128xf32>
    %64 = arith.subf %60, %63 : vector<8x128xf32>
    %cst_13 = arith.constant 0.000000e+00 : f32
    %65 = vector.broadcast %cst_13 : f32 to vector<8x128xf32>
    %66 = arith.maximumf %64, %65 : vector<8x128xf32>
    %67 = vector.broadcast %16 : vector<8x1xf32> to vector<8x128xf32>
    %68 = vector.broadcast %9 : vector<1x128xf32> to vector<8x128xf32>
    %69 = arith.minimumf %67, %68 : vector<8x128xf32>
    %70 = vector.broadcast %14 : vector<8x1xf32> to vector<8x128xf32>
    %71 = vector.broadcast %7 : vector<1x128xf32> to vector<8x128xf32>
    %72 = arith.maximumf %70, %71 : vector<8x128xf32>
    %73 = arith.subf %69, %72 : vector<8x128xf32>
    %cst_14 = arith.constant 0.000000e+00 : f32
    %74 = vector.broadcast %cst_14 : f32 to vector<8x128xf32>
    %75 = arith.maximumf %73, %74 : vector<8x128xf32>
    %76 = arith.mulf %66, %75 : vector<8x128xf32>
    %77 = arith.mulf %50, %53 : vector<8x1xf32>
    %78 = arith.mulf %54, %57 : vector<1x128xf32>
    %79 = vector.broadcast %77 : vector<8x1xf32> to vector<8x128xf32>
    %80 = vector.broadcast %78 : vector<1x128xf32> to vector<8x128xf32>
    %81 = arith.addf %79, %80 : vector<8x128xf32>
    %82 = arith.subf %81, %76 : vector<8x128xf32>
    %cst_15 = arith.constant 1.000000e-07 : f32
    %83 = vector.broadcast %cst_15 : f32 to vector<8x128xf32>
    %84 = arith.addf %82, %83 : vector<8x128xf32>
    %85 = tpu.reciprocal %84 {approx = true} : vector<8x128xf32> -> vector<8x128xf32>
    %86 = arith.mulf %76, %85 : vector<8x128xf32>
    %87 = vector.broadcast %15 : vector<8x1xf32> to vector<8x128xf32>
    %88 = vector.broadcast %8 : vector<1x128xf32> to vector<8x128xf32>
    %89 = arith.maximumf %87, %88 : vector<8x128xf32>
    %90 = vector.broadcast %13 : vector<8x1xf32> to vector<8x128xf32>
    %91 = vector.broadcast %6 : vector<1x128xf32> to vector<8x128xf32>
    %92 = arith.minimumf %90, %91 : vector<8x128xf32>
    %93 = arith.subf %89, %92 : vector<8x128xf32>
    %94 = vector.broadcast %16 : vector<8x1xf32> to vector<8x128xf32>
    %95 = vector.broadcast %9 : vector<1x128xf32> to vector<8x128xf32>
    %96 = arith.maximumf %94, %95 : vector<8x128xf32>
    %97 = vector.broadcast %14 : vector<8x1xf32> to vector<8x128xf32>
    %98 = vector.broadcast %7 : vector<1x128xf32> to vector<8x128xf32>
    %99 = arith.minimumf %97, %98 : vector<8x128xf32>
    %100 = arith.subf %96, %99 : vector<8x128xf32>
    %101 = arith.mulf %93, %93 : vector<8x128xf32>
    %102 = arith.mulf %100, %100 : vector<8x128xf32>
    %103 = arith.addf %101, %102 : vector<8x128xf32>
    %cst_16 = arith.constant 1.000000e-07 : f32
    %104 = vector.broadcast %cst_16 : f32 to vector<8x128xf32>
    %105 = arith.addf %103, %104 : vector<8x128xf32>
    %106 = arith.addf %6, %8 : vector<1x128xf32>
    %107 = vector.broadcast %106 : vector<1x128xf32> to vector<8x128xf32>
    %108 = vector.broadcast %13 : vector<8x1xf32> to vector<8x128xf32>
    %109 = arith.subf %107, %108 : vector<8x128xf32>
    %110 = vector.broadcast %15 : vector<8x1xf32> to vector<8x128xf32>
    %111 = arith.subf %109, %110 : vector<8x128xf32>
    %112 = arith.mulf %111, %111 : vector<8x128xf32>
    %113 = arith.addf %7, %9 : vector<1x128xf32>
    %114 = vector.broadcast %113 : vector<1x128xf32> to vector<8x128xf32>
    %115 = vector.broadcast %14 : vector<8x1xf32> to vector<8x128xf32>
    %116 = arith.subf %114, %115 : vector<8x128xf32>
    %117 = vector.broadcast %16 : vector<8x1xf32> to vector<8x128xf32>
    %118 = arith.subf %116, %117 : vector<8x128xf32>
    %119 = arith.mulf %118, %118 : vector<8x128xf32>
    %120 = arith.addf %112, %119 : vector<8x128xf32>
    %cst_17 = arith.constant 2.500000e-01 : f32
    %121 = vector.broadcast %cst_17 : f32 to vector<8x128xf32>
    %122 = arith.mulf %120, %121 : vector<8x128xf32>
    %123 = vector.broadcast %10 : vector<1x128xf32> to vector<8x128xf32>
    %124 = vector.broadcast %20 : vector<8x1xf32> to vector<8x128xf32>
    %125 = arith.subf %123, %124 : vector<8x128xf32>
    %126 = arith.mulf %125, %125 : vector<8x128xf32>
    %cst_18 = arith.constant 0.405284733 : f32
    %127 = vector.broadcast %cst_18 : f32 to vector<8x128xf32>
    %128 = arith.mulf %127, %126 : vector<8x128xf32>
    %129 = arith.subf %128, %86 : vector<8x128xf32>
    %cst_19 = arith.constant 1.00000012 : f32
    %130 = vector.broadcast %cst_19 : f32 to vector<8x128xf32>
    %131 = arith.addf %129, %130 : vector<8x128xf32>
    %132 = tpu.reciprocal %131 {approx = true} : vector<8x128xf32> -> vector<8x128xf32>
    %133 = arith.mulf %128, %132 : vector<8x128xf32>
    %134 = tpu.reciprocal %105 {approx = true} : vector<8x128xf32> -> vector<8x128xf32>
    %135 = arith.mulf %122, %134 : vector<8x128xf32>
    %136 = arith.mulf %128, %133 : vector<8x128xf32>
    %137 = arith.addf %135, %136 : vector<8x128xf32>
    %138 = arith.subf %86, %137 : vector<8x128xf32>
    %cst_20 = arith.constant 0.000000e+00 : f32
    %139 = vector.broadcast %cst_20 : f32 to vector<8x128xf32>
    %140 = arith.maximumf %138, %139 : vector<8x128xf32>
    %cst_21 = arith.constant 0.000000e+00 : f32
    %141 = vector.broadcast %cst_21 : f32 to vector<8x128xf32>
    %142 = arith.select %41, %140, %141 : vector<8x128xi1>, vector<8x128xf32>
    %143 = arith.mulf %142, %142 : vector<8x128xf32>
    %144 = arith.mulf %143, %143 : vector<8x128xf32>
    %145 = arith.mulf %143, %144 : vector<8x128xf32>
    %146 = arith.mulf %49, %145 : vector<8x128xf32>
    %c0_22 = arith.constant 0 : index
    %c0_23 = arith.constant 0 : index
    %c0_24 = arith.constant 0 : index
    %147 = vector.load %arg5[%c0_22, %c0_23, %c0_24] : memref<1x8x128xf32, #tpu.memory_space<vmem>>, vector<1x8x128xf32>
    %148 = vector.shape_cast %147 : vector<1x8x128xf32> to vector<8x128xf32>
    %149 = vector.shape_cast %142 : vector<8x128xf32> to vector<1x8x128xf32>
    tpu.vector_store %arg5[%c0_22, %c0_23, %c0_24], %149 {strides = array<i32>} : memref<1x8x128xf32, #tpu.memory_space<vmem>>, vector<1x8x128xf32>,
    %c0_25 = arith.constant 0 : index
    %c0_26 = arith.constant 0 : index
    %c0_27 = arith.constant 0 : index
    %150 = vector.load %arg6[%c0_25, %c0_26, %c0_27] : memref<1x8x128xf32, #tpu.memory_space<vmem>>, vector<1x8x128xf32>
    %151 = vector.shape_cast %150 : vector<1x8x128xf32> to vector<8x128xf32>
    %152 = vector.shape_cast %146 : vector<8x128xf32> to vector<1x8x128xf32>
    tpu.vector_store %arg6[%c0_25, %c0_26, %c0_27], %152 {strides = array<i32>} : memref<1x8x128xf32, #tpu.memory_space<vmem>>, vector<1x8x128xf32>,
    return
  }
  func.func @transform_0(%arg0: i32, %arg1: i32) -> (i32, i32, i32) {
    %c0_i32 = arith.constant 0 : i32
    %c0_i32_0 = arith.constant 0 : i32
    return %arg0, %arg1, %c0_i32 : i32, i32, i32
  }
  func.func @transform_1(%arg0: i32, %arg1: i32) -> (i32, i32, i32) {
    %c0_i32 = arith.constant 0 : i32
    %c0_i32_0 = arith.constant 0 : i32
    return %arg0, %c0_i32, %arg1 : i32, i32, i32
  }
  func.func @transform_2(%arg0: i32, %arg1: i32) -> (i32, i32, i32) {
    %c0_i32 = arith.constant 0 : i32
    %c0_i32_0 = arith.constant 0 : i32
    %c0_i32_1 = arith.constant 0 : i32
    return %arg0, %c0_i32, %c0_i32_0 : i32, i32, i32
  }
  func.func @transform_3(%arg0: i32, %arg1: i32) -> (i32, i32, i32) {
    %c0_i32 = arith.constant 0 : i32
    %c0_i32_0 = arith.constant 0 : i32
    return %arg0, %c0_i32, %arg1 : i32, i32, i32
  }
  func.func @transform_4(%arg0: i32, %arg1: i32) -> (i32, i32, i32) {
    %c0_i32 = arith.constant 0 : i32
    %c0_i32_0 = arith.constant 0 : i32
    return %arg0, %c0_i32, %arg1 : i32, i32, i32
  }
}

</mosaic_0001>

<bundles_post_ra>
// kernel: tpu_custom_call.1
= control target key start
LH: loop header
LB: loop body
LE: loop exit
PB: predicated region body
PF: predicated region fallthrough
CT: control target
= control target key end

     0   :  { %10 = vsyncpa [#allocation3], 0  ;;  %s1442_s0 = inlined_call_operand.vmem [shape: f32[2,256,80], index: 0, kind: input, shape index: {}]   ;;  %s1443_s1 = inlined_call_operand.vmem [shape: f32[2,8,256], index: 1, kind: input, shape index: {}]   ;;  %s1444_s2 = inlined_call_operand.vmem [shape: f32[2,8,8], index: 2, kind: input, shape index: {}]   ;;  %s1445_s3 = inlined_call_operand.hbm [shape: f32[2,8,256], index: 3, kind: output, shape index: {0}]   ;;  %s1446_s4 = inlined_call_operand.hbm [shape: f32[2,8,256], index: 4, kind: output, shape index: {1}]  }
   0x1   :  { %12 = vsyncpa [#allocation3 + $0x1], 0 }
   0x2   :  { %13 = vsyncpa [#allocation5], 0 }
   0x3   :  { %15 = vsyncpa [#allocation5 + $0x1], 0  ;;  %s1165_s15 = smov 0   ;;  %s1167_s16 = smov 0  }
   0x4   :  { %s1169_s17 = smov 0   ;;  %s1171_s18 = smov 0  }
   0x5   :  { %s1173_s19 = smov 0   ;;  %s1175_s20 = smov 0  }
   0x6   :  { %s1177_s21 = smov 0   ;;  %s1179_s22 = smov 0  }
   0x7 LB: > { %s770_s23 = sadd.s32 4294967295, %s1124_s22   ;;  %s771_s24 = sadd.s32 4294967294, %s1124_s22   ;;  %s1124_s22 = sphi %s1179_s22, %s21_s22   ;;  %s1120_s21 = sphi %s1177_s21, %s1459_s21   ;;  %s1116_s20 = sphi %s1175_s20, %s1458_s20   ;;  %s1112_s19 = sphi %s1173_s19, %s1457_s19   ;;  %s1108_s18 = sphi %s1171_s18, %s1456_s18   ;;  %s1104_s17 = sphi %s1169_s17, %s1455_s17   ;;  %s1100_s16 = sphi %s1167_s16, %s1454_s16   ;;  %s1096_s15 = sphi %s1165_s15, %s1453_s15  }
   0x8   : > { %s30_s25 = sadd.s32 1, %s1116_s20  ;;  %s33_s26 = sadd.s32 1, %s1120_s21 }
   0x9   : > { %p31_p0 = scmp.ge.s32.totalorder %s30_s25, 2  ;;  %p134_p1 = scmp.ne.s32.totalorder %s1104_s17, %s1100_s16 }
   0xa   : > { %p135_p2 = scmp.eq.s32.totalorder %s770_s23, 3  ;;  %p140_p5 = scmp.ne.s32.totalorder %s1100_s16, %s1096_s15 }
   0xb   : > { %s1461_s25 = smov (%p31_p0, %s30_s25), 0  ;;  %s1463_s26 = smov (!%p31_p0, %s33_s26), %s1120_s21 }
   0xc   : > { %s120_s27 = ssub.s32 %s1116_s20, %s1461_s25  ;;  %p1216_p3 = por %p135_p2, %p134_p1 }
   0xd   : > { %p35_p4 = scmp.ge.s32.totalorder %s1463_s26, 2  ;;  %p141_p6 = scmp.eq.s32.totalorder %s771_s24, 3 }
   0xe   : > { %p774_p7 = scmp.ge.s32.totalorder %s1124_s22, 1  ;;  %p218_p9 = scmp.lt.s32.totalorder %s1124_s22, 5 }
   0xf   : > { %s1465_s26 = smov (%p35_p4, %s1463_s26), 0  ;;  %p1225_p8 = por %p141_p6, %p140_p5 }
  0x10   : > { %s119_s30 = ssub.s32 %s1120_s21, %s1465_s26  ;;  %s124_s5 = sadd.s32 1, %s1104_s17 }
  0x11   : > { %s121_s6 = sor.u32 %s120_s27, %s119_s30  ;;  %p219_p10 = pnand %p774_p7, %p218_p9 }
  0x12   : > { %p122_p11 = scmp.eq.s32.totalorder %s121_s6, 0  ;;  %p266_p12 = scmp.lt.s32.totalorder (!%p219_p10), %s1112_s19, 1  ;;  %v1126_v0 = vmov (!%p219_p10), 4   ;;  %v1127_v1 = vmov (!%p219_p10), 0.0|0.0   ;;  %vm354_vm0 = vcmask (!%p219_p10), 654336   ;;  %vm1128_vm2 = vmmov (!%p219_p10), 0  }
  0x13   : > { %222 = sbr.rel (%p219_p10) target bundleno = 499 (0x1f3), region = 32  ;;  %983 = vset.pattern.permute.xlu0 (!%p219_p10), %v1126_v0  ;;  %s777_s8 = sshll.u32 (!%p219_p10), %s1108_s18, 4  ;;  %861 = vmatprep.subr.bf16.mxu0 (!%p219_p10), %v1127_v1  ;;  %vm1259_vm1 = vmpackc.low (!%p219_p10), %vm354_vm0, %vm354_vm0  ;;  %v1129_v9 = vmov (!%p219_p10), 0.0   ;;  %v1131_v13 = vmov (!%p219_p10), 0   ;;  %v1132_v20 = vmov (!%p219_p10), 1   ;;  %v1133_v23 = vmov (!%p219_p10), 2  }
  0x14   : > { %s1234_s7 = scalar_select %p122_p11, %s1104_s17, %s124_s5  }
  0x15   : > { %p268_p13 = scmp.lt.s32.totalorder (!%p219_p10), %s777_s8, 31  ;;  %858 = vmatprep.mubr.msk.f32.mxu0 (!%p219_p10), %vm1128_vm2, %v1129_v9  ;;  %s1130_s6 = smov (!%p219_p10), 2   ;;  %984 = vset.pattern.permute.xlu1 (!%p219_p10), %v1131_v13  ;;  %v306_v34 = vlaneseq (!%p219_p10)  ;;  %v1135_v52 = vmov (!%p219_p10), 3   ;;  %v1136_v57 = vmov (!%p219_p10), 6   ;;  %v1137_v62 = vmov (!%p219_p10), 5  }
  0x16   : > { %p277_p0 = scmp.lt.s32.totalorder (!%p219_p10), %s1108_s18, 1  ;;  %s803_s27 = sshll.u32 (!%p219_p10), %s1112_s19, 1 }
  0x17   : > { %v347_v35 = vand.u32 (!%p219_p10), 127, %v306_v34  ;;  %v307_v38 = vshrl.u32 (!%p219_p10), %v306_v34, 7 }
  0x19   : > { %v308_v42 = vsub.s32 (!%p219_p10), 5, %v307_v38  ;;  %v494_v44 = vsub.s32 (!%p219_p10), 0, %v307_v38  ;;  %v318_v50 = vsub.s32 (!%p219_p10), 6, %v307_v38  ;;  %v501_v51 = vsub.s32 (!%p219_p10), 3, %v307_v38 }
  0x1a   : > { %s1240_s9 = scalar_select %p266_p12, %s1112_s19, 1  ;;  %v506_v55 = vsub.s32 1, %v307_v38  ;;  %v566_v59 = vsub.s32 4, %v307_v38  ;;  %v489_v63 = vsub.s32 2, %v307_v38 }
  0x1b   : > { %s1467_s8 = smov (!%p268_p13, %s777_s8), 31 }
  0x1c   : > { %s782_s10 = sshll.u32 %s1240_s9, 3  ;;  %s778_s14 = sshll.u32 %s1240_s9, 5 }
  0x1d   : > { %s286_s13 = scalar_lea.vmem %s1444_s2, %s782_s10  ;;  %s271_s23 = sadd.s32 %s778_s14, %s1467_s8 }
  0x1e   : > { %v1247_v2 = vld [vmem:[%s286_s13] sm:$0xff]  ;;  %s779_s24 = sshll.u32 %s271_s23, 3  ;;  %s780_s10 = sshll.u32 %s1240_s9, 1 }
  0x1f   : > { %v893_v3 = vtrunc.f32 %v1247_v2  ;;  %s1253_s5 = scalar_lea.vmem %s1442_s0, %s779_s24  ;;  %s1134_s9 = smov 127   ;;  %vm339_vm4 = vcmp.gt.f32.partialorder %v1247_v2, 0.0 }
  0x20   : > { %v287_v5 = vld [vmem:[%s1253_s5] sm:$0xff]  ;;  %v288_v6 = vld [vmem:[%s1253_s5 + $0x8] sm:$0xff]  ;;  %v289_v10 = vld [vmem:[%s1253_s5 + $0x10] sm:$0xff]  ;;  %s278_s8 = scalar_select %p277_p0, %s1108_s18, 1  ;;  %v340_v60 = vsel %vm339_vm4, 1, %v1131_v13 }
  0x21   : > { %v894_v4 = vcvt.f32.s32 %v893_v3  ;;  %v862_v8 = vpack.c.bf16 %v288_v6, %v287_v5  ;;  %v290_v11 = vld [vmem:[%s1253_s5 + $0x18] sm:$0xff]  ;;  %v291_v14 = vld [vmem:[%s1253_s5 + $0x20] sm:$0xff]  ;;  %v292_v15 = vld [vmem:[%s1253_s5 + $0x28] sm:$0xff]  ;;  %s1334_s24 = sand.u32 1, %s1100_s16   ;;  %s1138_s14 = smov [#allocation2]  }
  0x22   : > { %v866_v12 = vpack.c.bf16 %v290_v11, %v289_v10  ;;  %v870_v16 = vpack.c.bf16 %v292_v15, %v291_v14  ;;  %v293_v17 = vld [vmem:[%s1253_s5 + $0x30] sm:$0xff]  ;;  %v294_v18 = vld [vmem:[%s1253_s5 + $0x38] sm:$0xff]  ;;  %v295_v21 = vld [vmem:[%s1253_s5 + $0x40] sm:$0xff]  ;;  %s280_s11 = sadd.s32 %s780_s10, %s278_s8  ;;  %s775_s30 = sshll.u32 %s1334_s24, 3 }
  0x23   : > { %349 = vperm.xlu0 %983, %v894_v4   ;;  %864 = vmatpush3.bf16.xpose.msk.msra.mxu0 %vm1259_vm1, %v862_v8  ;;  %v874_v19 = vpack.c.bf16 %v294_v18, %v293_v17  ;;  %v296_v22 = vld [vmem:[%s1253_s5 + $0x48] sm:$0xff]  ;;  %v297_v25 = vld [vmem:[%s1253_s5 + $0x50] sm:$0xff]  ;;  %v298_v26 = vld [vmem:[%s1253_s5 + $0x58] sm:$0xff]  ;;  %s781_s12 = sshll.u32 %s280_s11, 3  ;;  %s257_s8 = scalar_lea.vmem [#allocation2], %s775_s30 }
  0x24   : > { %865 = vmatprep.subr.bf16.mxu0 %v1127_v1  ;;  %v878_v24 = vpack.c.bf16 %v296_v22, %v295_v21  ;;  %v882_v27 = vpack.c.bf16 %v298_v26, %v297_v25  ;;  %v299_v28 = vld [vmem:[%s1253_s5 + $0x60] sm:$0xff]  ;;  %v300_v29 = vld [vmem:[%s1253_s5 + $0x68] sm:$0xff]  ;;  %v301_v31 = vld [vmem:[%s1253_s5 + $0x70] sm:$0xff]  ;;  %s282_s23 = scalar_lea.vmem %s1443_s1, %s781_s12  ;;  %s613_s10 = sshll.u32 %s257_s8, 4  ;;  %s1351_s10 = int_to_ptr.vmem [resolvable:$true] %s613_s10 }
  0x25   : > { %v886_v30 = vpack.c.bf16 %v300_v29, %v299_v28  ;;  %v302_v32 = vld [vmem:[%s1253_s5 + $0x78] sm:$0xff]  ;;  %v303_v43 = vld [vmem:[%s282_s23] sm:$0xff]  ;;  %s1339_s5 = sadd.s32 %s1108_s18, %s803_s27  ;;  %s593_s18 = scalar_lea.sflag [#allocation3], %s1334_s24 }
  0x26   : > { %v890_v33 = vpack.c.bf16 %v302_v32, %v301_v31  ;;  %v1311_v45 = vrot.slane %v303_v43, %v308_v42  ;;  %v495_v46 = vrot.slane %v303_v43, %v494_v44  ;;  %v545_v47 = vrot.slane %v303_v43, 2  ;;  %s998_s19 = scalar_lea.vmem %s1351_s10, 128  ;;  %s1002_s23 = sshll.u32 %s1138_s14, 4  ;;  %s1003_s23 = int_to_ptr.vmem [resolvable:$false] %s1002_s23 }
  0x27   : > { %477 = vrot.lane.b32.xlu0 %v1247_v2, %s1130_s6  ;;  %v319_v53 = vrot.slane %v303_v43, %v318_v50  ;;  %v502_v54 = vrot.slane %v303_v43, %v501_v51  ;;  %v507_v56 = vrot.slane %v303_v43, %v506_v55  ;;  %v1319_v61 = vrot.slane %v303_v43, %v566_v59  ;;  %s804_s6 = sshll.u32 %s1339_s5, 7  ;;  %p999_p1 = scmp.ne.s32.totalorder %s1351_s10, %s998_s19 }
  0x28   : > { %985 = vset.pattern.permute.xlu0 %v1132_v20  ;;  %v547_v48 = vadd.f32 %v545_v47, %v303_v43  ;;  %v490_v0 = vrot.slane %v303_v43, %v489_v63  ;;  %s1349_s13 = scalar_lea.hbm %s1445_s3, %s804_s6  ;;  %p1005_p5 = scmp.lt.s32.totalorder %s1351_s10, %s1003_s23 }
  0x29   : > { %p1000_p2 = pnand %p999_p1, %p1216_p3 }
  0x2a   : > { %v551_v49 = vrot.slane %v547_v48, %v494_v44  ;;  %v558_v58 = vrot.slane %v547_v48, %v506_v55 }
  0x2b   : > { %868 = vmatpush3.bf16.xpose.msk.msra.mxu0 %vm1259_vm1, %v866_v12  ;;  %321 = vperm.xlu0 %985, %v1247_v2   ;;  %p1001_p4 = pneg %p1000_p2 }
  0x2c   : > { %869 = vmatprep.subr.bf16.mxu0 %v1127_v1 }
  0x2f   : > { %988 = vset.pattern.permute.xlu0 %v1133_v23 }
  0x33   : > { %872 = vmatpush3.bf16.xpose.msk.msra.mxu0 %vm1259_vm1, %v870_v16 }
  0x34   : > { %873 = vmatprep.subr.bf16.mxu0 %v1127_v1 }
  0x3b   : > { %876 = vmatpush3.bf16.xpose.msk.msra.mxu0 %vm1259_vm1, %v874_v19 }
  0x3c   : > { %877 = vmatprep.subr.bf16.mxu0 %v1127_v1 }
  0x43   : > { %880 = vmatpush3.bf16.xpose.msk.msra.mxu0 %vm1259_vm1, %v878_v24 }
  0x44   : > { %881 = vmatprep.subr.bf16.mxu0 %v1127_v1 }
  0x4b   : > { %884 = vmatpush3.bf16.xpose.msk.msra.mxu0 %vm1259_vm1, %v882_v27 }
  0x4c   : > { %885 = vmatprep.subr.bf16.mxu0 %v1127_v1 }
  0x53   : > { %888 = vmatpush3.bf16.xpose.msk.msra.mxu0 %vm1259_vm1, %v886_v30 }
  0x54   : > { %889 = vmatprep.subr.bf16.mxu0 %v1127_v1  ;;  %v483_v1 = vrot.slane %v303_v43, 6 }
  0x56   : > { %v485_v3 = vsub.f32 %v303_v43, %v483_v1 }
  0x58   : > { %v486_v4 = vadd.f32 1e-07, %v485_v3 }
  0x5a   : > { %v518_v5 = vrot.slane %v486_v4, 1 }
  0x5b   : > { %892 = vmatpush3.bf16.xpose.msk.msra.mxu0 %vm1259_vm1, %v890_v33 }
  0x5c   : > { %v520_v6 = vmul.f32 %v518_v5, %v485_v3 }
  0xa2   : > { %v350_v36 = vpop.permute.xlu0 %349 }
  0xa3   : > { %vm351_vm3 = vcmp.eq.s32.totalorder %v347_v35, %v350_v36 }
  0xa4   : > { %v783_v37 = vsel %vm351_vm3, 1.0, %v1129_v9  ;;  %v529_v9 = vrot.slane %v520_v6, %v489_v63 }
  0xa5   : > { %859 = vmatmul.mubr.msk.f32.vlgmr.msra.gmra.mrb[0].mxu0 %vm354_vm0, %v783_v37 }
  0xa6   : > { %v478_v39 = vpop.permute.xlu0 %477 }
  0xa7   : > { %v480_v40 = vsub.f32 %v1247_v2, %v478_v39 }
  0xa9   : > { %v481_v41 = vadd.f32 1e-07, %v480_v40 }
  0xab   : > { %513 = vrot.lane.b32.xlu1 %v481_v41, %s1134_s9  ;;  %s1004_s9 = scalar_lea.vmem %s1003_s23, 256 }
  0xac   : > { %p1006_p6 = scmp.lt.s32.totalorder %s1004_s9, %s998_s19 }
  0xae   : > { %p1007_p7 = por %p1006_p6, %p1005_p5 }
  0xaf   : > { %312 = vperm.xlu1 %984, %v1247_v2  }
  0xb0   : > { %p1008_p9 = pnand %p1007_p7, %p1001_p4 }
  0xb3   : > { %986 = vset.pattern.permute.xlu1 %v1133_v23 }
  0xb4   : > { %327 = vperm.xlu1 %986, %v1247_v2  }
  0xb8   : > { %987 = vset.pattern.permute.xlu1 %v1135_v52 }
  0xb9   : > { %332 = vperm.xlu1 %987, %v1247_v2  }
  0xbd   : > { %989 = vset.pattern.permute.xlu1 %v1136_v57 }
  0xbe   : > { %569 = vperm.xlu1 %989, %v1247_v2   ;;  %v322_v2 = vpop.permute.xlu0 %321 }
  0xbf   : > { %v324_v10 = vsub.f32 %v319_v53, %v322_v2  ;;  %v559_v21 = vsub.f32 %v558_v58, %v322_v2  ;;  %v508_v25 = vmax.f32 %v322_v2, %v507_v56  ;;  %v539_v26 = vmin.f32 %v322_v2, %v507_v56 }
  0xc2   : > { %990 = vset.pattern.permute.xlu1 %v1137_v62 }
  0xc3   : > { %342 = vperm.xlu1 %990, %v340_v60  }
 0x11d   : > { %v514_v7 = vpop.permute.xlu1 %513 }
 0x11e   : > { %v516_v8 = vmul.f32 %v514_v7, %v480_v40 }
 0x120   : > { %523 = vperm.xlu0 %988, %v516_v8  }
 0x124   : > { %991 = vset.pattern.permute.xlu0 %v1136_v57 }
 0x12e   : > { %v313_v11 = vpop.permute.xlu1 %312 }
 0x12f   : > { %v315_v12 = vsub.f32 %v1311_v45, %v313_v11  ;;  %v552_v13 = vsub.f32 %v551_v49, %v313_v11  ;;  %v496_v15 = vmax.f32 %v313_v11, %v495_v46  ;;  %v536_v16 = vmin.f32 %v313_v11, %v495_v46 }
 0x131   : > { %v325_v14 = vmin.f32 %v315_v12, %v324_v10 }
 0x133   : > { %v328_v17 = vpop.permute.xlu1 %327 }
 0x134   : > { %v553_v18 = vsub.f32 %v552_v13, %v328_v17  ;;  %v491_v19 = vmin.f32 %v328_v17, %v490_v0  ;;  %v535_v20 = vmax.f32 %v328_v17, %v490_v0  ;;  %v330_v24 = vsub.f32 %v328_v17, %v1311_v45 }
 0x136   : > { %v497_v22 = vsub.f32 %v491_v19, %v496_v15  ;;  %v537_v23 = vsub.f32 %v535_v20, %v536_v16  ;;  %v554_v27 = vmul.f32 %v553_v18, %v553_v18 }
 0x138   : > { %v333_v28 = vpop.permute.xlu1 %332  ;;  %v498_v33 = vmax.f32 %v497_v22, 0.0  ;;  %v541_v34 = vmul.f32 %v537_v23, %v537_v23 }
 0x139   : > { %v335_v29 = vsub.f32 %v333_v28, %v319_v53  ;;  %v503_v30 = vmin.f32 %v333_v28, %v502_v54  ;;  %v538_v31 = vmax.f32 %v333_v28, %v502_v54  ;;  %v560_v32 = vsub.f32 %v559_v21, %v333_v28 }
 0x13b   : > { %v540_v35 = vsub.f32 %v538_v31, %v539_v26  ;;  %v561_v36 = vmul.f32 %v560_v32, %v560_v32  ;;  %v336_v37 = vmin.f32 %v330_v24, %v335_v29  ;;  %v509_v38 = vsub.f32 %v503_v30, %v508_v25 }
 0x13d   : > { %v542_v39 = vmul.f32 %v540_v35, %v540_v35  ;;  %v562_v40 = vadd.f32 %v561_v36, %v554_v27  ;;  %v337_v41 = vmin.f32 %v325_v14, %v336_v37  ;;  %v510_v42 = vmax.f32 %v509_v38, 0.0  ;;  %v570_v49 = vpop.permute.xlu1 %569 }
 0x13e   : > { %v572_v59 = vsub.f32 %v1319_v61, %v570_v49 }
 0x13f   : > { %v511_v43 = vmul.f32 %v510_v42, %v498_v33  ;;  %v543_v44 = vadd.f32 %v542_v39, %v541_v34  ;;  %v563_v46 = vmul.f32 0.25, %v562_v40  ;;  %vm338_vm5 = vcmp.gt.f32.partialorder %v337_v41, 1e-09 }
 0x140   : > { %v573_v60 = vmul.f32 %v572_v59, %v572_v59 }
 0x141   : > { %v544_v45 = vadd.f32 1e-07, %v543_v44 }
 0x142   : > { %v343_v50 = vpop.permute.xlu1 %342  ;;  %v574_v62 = vmul.f32 0.40528473, %v573_v60 }
 0x143   : > { %992 = vrcp.f32 %v544_v45  ;;  %vm344_vm6 = vcmp.eq.s32.totalorder %v343_v50, 1 }
 0x144   : > { %vm1323_vm7 = vmand %vm338_vm5, %vm344_vm6 }
 0x14d   : > { %v993_v47 = vpop.eup %992 }
 0x14e   : > { %v580_v48 = vmul.f32 %v993_v47, %v563_v46 }
 0x178   : > { %v1327_v52 = vpop.f32.mrb[0].mxu0 }
 0x179   : > { %v476_v53 = vsel %vm1323_vm7, %v1327_v52, 0.0  ;;  %v860_v54 = vpop.f32.mrb[1].mxu0 }
 0x19f   : > { %v524_v55 = vpop.permute.xlu0 %523 }
 0x1a0   : > { %v530_v56 = vadd.f32 %v529_v9, %v524_v55 }
 0x1a2   : > { %v531_v57 = vsub.f32 %v530_v56, %v511_v43 }
 0x1a4   : > { %v532_v58 = vadd.f32 1e-07, %v531_v57 }
 0x1a6   : > { %994 = vrcp.f32 %v532_v58 }
 0x1b0   : > { %v995_v63 = vpop.eup %994 }
 0x1b1   : > { %v534_v0 = vmul.f32 %v995_v63, %v511_v43 }
 0x1b3   : > { %v575_v1 = vsub.f32 %v574_v62, %v534_v0 }
 0x1b5   : > { %v576_v3 = vadd.f32 1.0000001, %v575_v1 }
 0x1b7   : > { %996 = vrcp.f32 %v576_v3 }
 0x1c1   : > { %v997_v4 = vpop.eup %996 }
 0x1c2   : > { %v578_v5 = vmul.f32 %v997_v4, %v574_v62 }
 0x1c4   : > { %v581_v6 = vmul.f32 %v578_v5, %v574_v62 }
 0x1c6   : > { %v582_v61 = vadd.f32 %v581_v6, %v580_v48 }
 0x1c8   : > { %v583_v7 = vsub.f32 %v534_v0, %v582_v61 }
 0x1ca   : > { %v584_v8 = vmax.f32 %v583_v7, 0.0 }
 0x1cc   : > { %v585_v9 = vsel %vm1323_vm7, %v584_v8, 0.0 }
 0x1cd   : > { %v586_v2 = vmul.f32 %v585_v9, %v585_v9  ;;  %590 = vst [vmem:[%s257_s8] sm:$0xff] %v585_v9 }
 0x1ce   : > { %1011 = shalt.err (!%p1008_p9)
}
 0x1cf   : > { %s1012_s27 = scalar_lea.hbm %s1349_s13, 128  ;;  %s1016_s12 = scalar_lea.hbm %s1445_s3, 512 }
 0x1d0   : > { %p1013_p10 = scmp.ne.s32.totalorder %s1349_s13, %s1012_s27  ;;  %p1017_p13 = scmp.lt.u32.totalorder %s1349_s13, %s1445_s3 }
 0x1d1   : > { %p1018_p0 = scmp.lt.u32.totalorder %s1016_s12, %s1012_s27  ;;  %p1020_p2 = scmp.lt.u32.totalorder %s1012_s27, %s1349_s13 }
 0x1d2   : > { %p1014_p11 = pnand %p1013_p10, %p1216_p3 }
 0x1d3   : > { %p1019_p1 = por %p1018_p0, %p1017_p13 }
 0x1d4   : > { %p1015_p12 = pneg %p1014_p11 }
 0x1d5   : > { %p1021_p4 = por %p1020_p2, %p1019_p1 }
 0x1d7   : > { %p1022_p5 = pnand %p1021_p4, %p1015_p12 }
 0x1d9   : > { %1025 = shalt.err (!%p1022_p5)
}
 0x1da   : > { %895 = dma.vmem_to_hbm [thread:$0]  (%p1216_p3), %s1351_s10, 128, %s1349_s13, %s593_s18   ;;  %v587_v10 = vmul.f32 %v586_v2, %v586_v2 }
 0x1db   : > { %s264_s19 = scalar_lea.vmem [#allocation4], %s775_s30  ;;  %s1388_s11 = scalar_lea.hbm %s1446_s4, %s804_s6 }
 0x1dc   : > { %s628_s9 = sshll.u32 %s264_s19, 4  ;;  %v588_v11 = vmul.f32 %v587_v10, %v586_v2  ;;  %s598_s30 = scalar_lea.sflag [#allocation5], %s1334_s24  ;;  %s1390_s9 = int_to_ptr.vmem [resolvable:$true] %s628_s9 }
 0x1dd   : > { %s1026_s10 = scalar_lea.vmem %s1390_s9, 128  ;;  %s1139_s13 = smov [#allocation4]  }
 0x1de   : > { %v589_v12 = vmul.f32 %v588_v11, %v476_v53  ;;  %p1027_p6 = scmp.ne.s32.totalorder %s1390_s9, %s1026_s10  ;;  %s1030_s18 = sshll.u32 %s1139_s13, 4  ;;  %s1031_s18 = int_to_ptr.vmem [resolvable:$false] %s1030_s18 }
 0x1df   : > { %s1032_s5 = scalar_lea.vmem %s1031_s18, 256  ;;  %p1033_p10 = scmp.lt.s32.totalorder %s1390_s9, %s1031_s18 }
 0x1e0   : > { %591 = vst [vmem:[%s264_s19] sm:$0xff] %v589_v12  ;;  %p1028_p7 = pnand %p1027_p6, %p1216_p3  ;;  %p1034_p11 = scmp.lt.s32.totalorder %s1032_s5, %s1026_s10 }
 0x1e2   : > { %p1029_p9 = pneg %p1028_p7  ;;  %p1035_p12 = por %p1034_p11, %p1033_p10 }
 0x1e4   : > { %p1036_p13 = pnand %p1035_p12, %p1029_p9 }
 0x1e6   : > { %1039 = shalt.err (!%p1036_p13)
}
 0x1e7   : > { %s1040_s24 = scalar_lea.hbm %s1388_s11, 128  ;;  %s1044_s14 = scalar_lea.hbm %s1446_s4, 512 }
 0x1e8   : > { %p1041_p0 = scmp.ne.s32.totalorder %s1388_s11, %s1040_s24  ;;  %p1045_p4 = scmp.lt.u32.totalorder %s1388_s11, %s1446_s4 }
 0x1e9   : > { %p1046_p5 = scmp.lt.u32.totalorder %s1044_s14, %s1040_s24  ;;  %p1048_p7 = scmp.lt.u32.totalorder %s1040_s24, %s1388_s11 }
 0x1ea   : > { %p1042_p1 = pnand %p1041_p0, %p1216_p3 }
 0x1eb   : > { %p1047_p6 = por %p1046_p5, %p1045_p4 }
 0x1ec   : > { %p1043_p2 = pneg %p1042_p1 }
 0x1ed   : > { %p1049_p9 = por %p1048_p7, %p1047_p6 }
 0x1ef   : > { %p1050_p10 = pnand %p1049_p9, %p1043_p2 }
 0x1f1   : > { %1053 = shalt.err (!%p1050_p10)
}
 0x1f2   : > { %896 = dma.vmem_to_hbm [thread:$0]  (%p1216_p3), %s1390_s9, 128, %s1388_s11, %s598_s30  }
 0x1f3 PF: > { %p906_p11 = scmp.ge.s32.totalorder %s1124_s22, 2  ;;  %s640_s27 = sand.u32 1, %s1096_s15  }
 0x1f4   : > { %s641_s8 = scalar_lea.sflag [#allocation3], %s640_s27 }
 0x1f5   : > { %p900_p12 = pnand %p906_p11, %p1225_p8 }
 0x1f7   : > { %1087 = dma.done.wait (!%p900_p12), %s641_s8, 128  }
 0x1f8   : > { %1089 = vsyncadd (!%p900_p12), %s641_s8, 4294967168  ;;  %s650_s10 = scalar_lea.sflag [#allocation5], %s640_s27 }
 0x1f9   : > { %1091 = dma.done.wait (!%p900_p12), %s650_s10, 128  }
 0x1fa   : > { %1093 = vsyncadd (!%p900_p12), %s650_s10, 4294967168  ;;  %s21_s22 = sadd.s32 1, %s1124_s22   ;;  %s1453_s15 = smov %s1100_s16 }
 0x1fb   : > { %p18_p13 = scmp.ge.s32.totalorder %s21_s22, 6   ;;  %s1454_s16 = smov %s1104_s17 }
 0x1fc   : > { %s1455_s17 = smov %s1234_s7  ;;  %s1456_s18 = smov %s1116_s20 }
 0x1fd   : > { %s1457_s19 = smov %s1120_s21  ;;  %s1458_s20 = smov %s1461_s25 }
 0x1fe   : > { %s1459_s21 = smov %s1465_s26  ;;  %20 = sbr.rel (!%p18_p13) target bundleno = 7 (0x7), region = 90 }
 0x205   :  { %655 = vsyncpa [#allocation3], 1 }
 0x206   :  { %657 = vsyncpa [#allocation3 + $0x1], 1 }
 0x207   :  { %658 = vsyncpa [#allocation5], 1 }
 0x208   :  { %660 = vsyncpa [#allocation5 + $0x1], 1 }

</bundles_post_ra>
